<compile_context>
chip_gen: v7x
topology: tpu7x:2x2x1
jax: 0.10.0
libtpu: 0.0.40
codegen_flags: <defaults>
</compile_context>

<pallas_src>
import functools

import jax
import jax.numpy as jnp
import numpy as np
from jax.experimental import pallas as pl
from jax.experimental.pallas import tpu as pltpu


def _lstm_recurrence_kernel(gin_ref,     # (T, B, 4H)  precomputed input gates + biases
                            whh_ref,     # (H, 4H)     hidden->gates weight (transposed)
                            hseq_ref,    # (T, B, H)   per-step hidden states (lane-dense out)
                            h_out_ref,   # (B, H)      final hidden state
                            c_out_ref):  # (B, H)      final cell state
    T, B, _ = gin_ref.shape
    H = whh_ref.shape[0]

    whh = whh_ref[...]                                   # load once, resident in vregs/VMEM

    def step(t, carry):
        h_prev, c_prev = carry
        # Only the truly serial work remains per step: h_prev @ W_hh + combine.
        gates = gin_ref[t] + jnp.dot(h_prev, whh,
                                     preferred_element_type=jnp.float32)   # (B, 4H)

        # Full-block nonlinearities (2 EUP passes instead of 4 quarter-vreg ones),
        # then slice the four H-wide gates.  PyTorch gate order: i, f, g, o.
        sig = jax.nn.sigmoid(gates)
        th = jnp.tanh(gates)
        i_g = sig[:, 0 * H:1 * H]
        f_g = sig[:, 1 * H:2 * H]
        g_g = th[:, 2 * H:3 * H]
        o_g = sig[:, 3 * H:4 * H]

        c_new = f_g * c_prev + i_g * g_g
        h_new = o_g * jnp.tanh(c_new)

        hseq_ref[t] = h_new                               # lane-dense (B, H) store
        return h_new, c_new

    # mem_in is None in the reference forward => h0 = c0 = 0.
    # TODO(synk): plumb an optional (h0, c0) input to support a non-None mem_in.
    h0 = jnp.zeros((B, H), jnp.float32)
    c0 = jnp.zeros((B, H), jnp.float32)
    h_fin, c_fin = jax.lax.fori_loop(0, T, step, (h0, c0), unroll=True)

    h_out_ref[...] = h_fin
    c_out_ref[...] = c_fin


@functools.partial(jax.jit, static_argnames=())
def lstm_reg_forward(x, params):
    """x: (B, T, input_size) float32.  Returns (y, (h_n, c_n)) like the torch module."""
    (w1, b1, w_ih, w_hh, b_ih, b_hh, w2, b2) = params
    B, T, I = x.shape
    H = w1.shape[0]          # fc1 weight is (H, I) in torch convention
    O = w2.shape[0]          # fc2 weight is (O, H)

    # ---- Hoisted batched projections (one big MXU-friendly matmul each) ----
    z = jnp.tanh(x @ w1.T + b1)                              # (B, T, H)
    gates_in = z @ w_ih.T + (b_ih + b_hh)                    # (B, T, 4H), biases pre-combined
    gates_in_tm = jnp.transpose(gates_in, (1, 0, 2))         # (T, B, 4H) time-major
    gates_in_tm = gates_in_tm.astype(jnp.float32)

    whh_t = w_hh.T.astype(jnp.float32)                       # (H, 4H)

    # ---- Serial LSTM recurrence: single Pallas invocation, no grid ----
    vmem_spec = pl.BlockSpec(memory_space=pltpu.MemorySpace.VMEM)
    hseq_tm, h_n, c_n = pl.pallas_call(
        _lstm_recurrence_kernel,
        out_shape=(
            jax.ShapeDtypeStruct((T, B, H), jnp.float32),    # hidden sequence (lane-dense)
            jax.ShapeDtypeStruct((B, H), jnp.float32),       # h_n
            jax.ShapeDtypeStruct((B, H), jnp.float32),       # c_n
        ),
        in_specs=[vmem_spec, vmem_spec],
        out_specs=(vmem_spec, vmem_spec, vmem_spec),
    )(gates_in_tm, whh_t)

    # ---- fc2 + tanh on the whole hidden sequence (single batched matmul) ----
    hseq = jnp.transpose(hseq_tm, (1, 0, 2))                 # (B, T, H)
    y = jnp.tanh(hseq @ w2.T + b2)                           # (B, T, O)

    # torch returns (h_n, c_n) with shape (num_layers=1, B, H)
    return y, (h_n[None, :, :], c_n[None, :, :])


def _reference_forward(x, params):
    """Pure-JAX reference matching torch semantics (for sanity check)."""
    (w1, b1, w_ih, w_hh, b_ih, b_hh, w2, b2) = params
    B, T, I = x.shape
    H = w1.shape[0]
    z = jnp.tanh(x @ w1.T + b1)                              # (B, T, H)
    h = jnp.zeros((B, H), jnp.float32)
    c = jnp.zeros((B, H), jnp.float32)
    ys = []
    for t in range(T):
        g = z[:, t] @ w_ih.T + b_ih + h @ w_hh.T + b_hh
        i_g = jax.nn.sigmoid(g[:, 0 * H:1 * H])
        f_g = jax.nn.sigmoid(g[:, 1 * H:2 * H])
        g_g = jnp.tanh(g[:, 2 * H:3 * H])
        o_g = jax.nn.sigmoid(g[:, 3 * H:4 * H])
        c = f_g * c + i_g * g_g
        h = o_g * jnp.tanh(c)
        ys.append(h)
    hseq = jnp.stack(ys, axis=1)                             # (B, T, H)
    y = jnp.tanh(hseq @ w2.T + b2)
    return y, (h[None], c[None])


def init_params(key, input_size, hidden_size, output_size=1):
    """Deterministic init mimicking torch default U(-1/sqrt(fan_in), 1/sqrt(fan_in))."""
    ks = jax.random.split(key, 8)

    def unif(k, shape, fan_in):
        bound = 1.0 / np.sqrt(fan_in)
        return jax.random.uniform(k, shape, jnp.float32, -bound, bound)

    w1 = unif(ks[0], (hidden_size, input_size), input_size)
    b1 = unif(ks[1], (hidden_size,), input_size)
    w_ih = unif(ks[2], (4 * hidden_size, hidden_size), hidden_size)
    w_hh = unif(ks[3], (4 * hidden_size, hidden_size), hidden_size)
    b_ih = unif(ks[4], (4 * hidden_size,), hidden_size)
    b_hh = unif(ks[5], (4 * hidden_size,), hidden_size)
    w2 = unif(ks[6], (output_size, hidden_size), hidden_size)
    b2 = unif(ks[7], (output_size,), hidden_size)
    return (w1, b1, w_ih, w_hh, b_ih, b_hh, w2, b2)


if __name__ == "__main__":
    B, T, INPUT, HIDDEN, OUTPUT = 2, 8, 16, 32, 1

    key = jax.random.PRNGKey(0)
    k_x, k_p = jax.random.split(key)
    x = jax.random.normal(k_x, (B, T, INPUT), jnp.float32)
    params = init_params(k_p, INPUT, HIDDEN, OUTPUT)

    y, (h_n, c_n) = lstm_reg_forward(x, params)
    jax.block_until_ready((y, h_n, c_n))

    # sanity check against a pure-JAX reference
    y_ref, (h_ref, c_ref) = _reference_forward(x, params)
    np.testing.assert_allclose(np.asarray(y), np.asarray(y_ref), atol=1e-2, rtol=1e-2)
    np.testing.assert_allclose(np.asarray(h_n), np.asarray(h_ref), atol=1e-2, rtol=1e-2)
    np.testing.assert_allclose(np.asarray(c_n), np.asarray(c_ref), atol=1e-2, rtol=1e-2)

    print("KERNEL_OK")
</pallas_src>

<mosaic_0001>
module attributes {stable_mosaic.version = 11 : i64} {
  func.func @_lstm_recurrence_kernel(%arg0: memref<8x2x128xf32, #tpu.memory_space<vmem>>, %arg1: memref<32x128xf32, #tpu.memory_space<vmem>>, %arg2: memref<8x2x32xf32, #tpu.memory_space<vmem>>, %arg3: memref<2x32xf32, #tpu.memory_space<vmem>>, %arg4: memref<2x32xf32, #tpu.memory_space<vmem>>) attributes {dimension_semantics = [], scalar_prefetch = 0 : i64, scratch_operands = 0 : i64, tpu.core_type = #tpu.core_type<tc>} {
    %c0 = arith.constant 0 : index
    %c0_0 = arith.constant 0 : index
    %0 = vector.load %arg1[%c0, %c0_0] : memref<32x128xf32, #tpu.memory_space<vmem>>, vector<32x128xf32>
    %cst = arith.constant 0.000000e+00 : f32
    %1 = vector.broadcast %cst : f32 to vector<2x32xf32>
    %cst_1 = arith.constant 0.000000e+00 : f32
    %2 = vector.broadcast %cst_1 : f32 to vector<2x32xf32>
    %c0_i32 = arith.constant 0 : i32
    %3 = arith.index_cast %c0_i32 : i32 to index
    %c0_2 = arith.constant 0 : index
    %c0_3 = arith.constant 0 : index
    %4 = vector.load %arg0[%3, %c0_2, %c0_3] : memref<8x2x128xf32, #tpu.memory_space<vmem>>, vector<1x2x128xf32>
    %5 = vector.shape_cast %4 : vector<1x2x128xf32> to vector<2x128xf32>
    %cst_4 = arith.constant dense<0.000000e+00> : vector<2x128xf32>
    %6 = tpu.matmul %1, %0, %cst_4 {dimension_numbers = #tpu.dot_dimension_numbers<[1], [0], [0], [1], [0, 0, 1, 1], [], []>} : vector<2x32xf32>, vector<32x128xf32>, vector<2x128xf32> -> vector<2x128xf32>
    %7 = arith.addf %5, %6 : vector<2x128xf32>
    %8 = arith.negf %7 : vector<2x128xf32>
    %9 = math.exp %8 : vector<2x128xf32>
    %cst_5 = arith.constant 1.000000e+00 : f32
    %10 = vector.broadcast %cst_5 : f32 to vector<2x128xf32>
    %11 = arith.addf %10, %9 : vector<2x128xf32>
    %12 = arith.divf %10, %11 : vector<2x128xf32>
    %13 = math.tanh %7 : vector<2x128xf32>
    %14 = vector.extract_strided_slice %12 {offsets = [0, 0], sizes = [2, 32], strides = [1, 1]} : vector<2x128xf32> to vector<2x32xf32>
    %15 = vector.extract_strided_slice %12 {offsets = [0, 32], sizes = [2, 32], strides = [1, 1]} : vector<2x128xf32> to vector<2x32xf32>
    %16 = vector.extract_strided_slice %13 {offsets = [0, 64], sizes = [2, 32], strides = [1, 1]} : vector<2x128xf32> to vector<2x32xf32>
    %17 = vector.extract_strided_slice %12 {offsets = [0, 96], sizes = [2, 32], strides = [1, 1]} : vector<2x128xf32> to vector<2x32xf32>
    %18 = arith.mulf %15, %2 : vector<2x32xf32>
    %19 = arith.mulf %14, %16 : vector<2x32xf32>
    %20 = arith.addf %18, %19 : vector<2x32xf32>
    %21 = math.tanh %20 : vector<2x32xf32>
    %22 = arith.mulf %17, %21 : vector<2x32xf32>
    %23 = arith.index_cast %c0_i32 : i32 to index
    %c0_6 = arith.constant 0 : index
    %c0_7 = arith.constant 0 : index
    %24 = vector.load %arg2[%23, %c0_6, %c0_7] : memref<8x2x32xf32, #tpu.memory_space<vmem>>, vector<1x2x32xf32>
    %25 = vector.shape_cast %24 : vector<1x2x32xf32> to vector<2x32xf32>
    %26 = vector.shape_cast %22 : vector<2x32xf32> to vector<1x2x32xf32>
    tpu.vector_store %arg2[%23, %c0_6, %c0_7], %26 {strides = array<i32>} : memref<8x2x32xf32, #tpu.memory_space<vmem>>, vector<1x2x32xf32>,
    %c1_i32 = arith.constant 1 : i32
    %27 = arith.index_cast %c1_i32 : i32 to index
    %c0_8 = arith.constant 0 : index
    %c0_9 = arith.constant 0 : index
    %28 = vector.load %arg0[%27, %c0_8, %c0_9] : memref<8x2x128xf32, #tpu.memory_space<vmem>>, vector<1x2x128xf32>
    %29 = vector.shape_cast %28 : vector<1x2x128xf32> to vector<2x128xf32>
    %cst_10 = arith.constant dense<0.000000e+00> : vector<2x128xf32>
    %30 = tpu.matmul %22, %0, %cst_10 {dimension_numbers = #tpu.dot_dimension_numbers<[1], [0], [0], [1], [0, 0, 1, 1], [], []>} : vector<2x32xf32>, vector<32x128xf32>, vector<2x128xf32> -> vector<2x128xf32>
    %31 = arith.addf %29, %30 : vector<2x128xf32>
    %32 = arith.negf %31 : vector<2x128xf32>
    %33 = math.exp %32 : vector<2x128xf32>
    %cst_11 = arith.constant 1.000000e+00 : f32
    %34 = vector.broadcast %cst_11 : f32 to vector<2x128xf32>
    %35 = arith.addf %34, %33 : vector<2x128xf32>
    %36 = arith.divf %34, %35 : vector<2x128xf32>
    %37 = math.tanh %31 : vector<2x128xf32>
    %38 = vector.extract_strided_slice %36 {offsets = [0, 0], sizes = [2, 32], strides = [1, 1]} : vector<2x128xf32> to vector<2x32xf32>
    %39 = vector.extract_strided_slice %36 {offsets = [0, 32], sizes = [2, 32], strides = [1, 1]} : vector<2x128xf32> to vector<2x32xf32>
    %40 = vector.extract_strided_slice %37 {offsets = [0, 64], sizes = [2, 32], strides = [1, 1]} : vector<2x128xf32> to vector<2x32xf32>
    %41 = vector.extract_strided_slice %36 {offsets = [0, 96], sizes = [2, 32], strides = [1, 1]} : vector<2x128xf32> to vector<2x32xf32>
    %42 = arith.mulf %39, %20 : vector<2x32xf32>
    %43 = arith.mulf %38, %40 : vector<2x32xf32>
    %44 = arith.addf %42, %43 : vector<2x32xf32>
    %45 = math.tanh %44 : vector<2x32xf32>
    %46 = arith.mulf %41, %45 : vector<2x32xf32>
    %47 = arith.index_cast %c1_i32 : i32 to index
    %c0_12 = arith.constant 0 : index
    %c0_13 = arith.constant 0 : index
    %48 = vector.load %arg2[%47, %c0_12, %c0_13] : memref<8x2x32xf32, #tpu.memory_space<vmem>>, vector<1x2x32xf32>
    %49 = vector.shape_cast %48 : vector<1x2x32xf32> to vector<2x32xf32>
    %50 = vector.shape_cast %46 : vector<2x32xf32> to vector<1x2x32xf32>
    tpu.vector_store %arg2[%47, %c0_12, %c0_13], %50 {strides = array<i32>} : memref<8x2x32xf32, #tpu.memory_space<vmem>>, vector<1x2x32xf32>,
    %c2_i32 = arith.constant 2 : i32
    %51 = arith.index_cast %c2_i32 : i32 to index
    %c0_14 = arith.constant 0 : index
    %c0_15 = arith.constant 0 : index
    %52 = vector.load %arg0[%51, %c0_14, %c0_15] : memref<8x2x128xf32, #tpu.memory_space<vmem>>, vector<1x2x128xf32>
    %53 = vector.shape_cast %52 : vector<1x2x128xf32> to vector<2x128xf32>
    %cst_16 = arith.constant dense<0.000000e+00> : vector<2x128xf32>
    %54 = tpu.matmul %46, %0, %cst_16 {dimension_numbers = #tpu.dot_dimension_numbers<[1], [0], [0], [1], [0, 0, 1, 1], [], []>} : vector<2x32xf32>, vector<32x128xf32>, vector<2x128xf32> -> vector<2x128xf32>
    %55 = arith.addf %53, %54 : vector<2x128xf32>
    %56 = arith.negf %55 : vector<2x128xf32>
    %57 = math.exp %56 : vector<2x128xf32>
    %cst_17 = arith.constant 1.000000e+00 : f32
    %58 = vector.broadcast %cst_17 : f32 to vector<2x128xf32>
    %59 = arith.addf %58, %57 : vector<2x128xf32>
    %60 = arith.divf %58, %59 : vector<2x128xf32>
    %61 = math.tanh %55 : vector<2x128xf32>
    %62 = vector.extract_strided_slice %60 {offsets = [0, 0], sizes = [2, 32], strides = [1, 1]} : vector<2x128xf32> to vector<2x32xf32>
    %63 = vector.extract_strided_slice %60 {offsets = [0, 32], sizes = [2, 32], strides = [1, 1]} : vector<2x128xf32> to vector<2x32xf32>
    %64 = vector.extract_strided_slice %61 {offsets = [0, 64], sizes = [2, 32], strides = [1, 1]} : vector<2x128xf32> to vector<2x32xf32>
    %65 = vector.extract_strided_slice %60 {offsets = [0, 96], sizes = [2, 32], strides = [1, 1]} : vector<2x128xf32> to vector<2x32xf32>
    %66 = arith.mulf %63, %44 : vector<2x32xf32>
    %67 = arith.mulf %62, %64 : vector<2x32xf32>
    %68 = arith.addf %66, %67 : vector<2x32xf32>
    %69 = math.tanh %68 : vector<2x32xf32>
    %70 = arith.mulf %65, %69 : vector<2x32xf32>
    %71 = arith.index_cast %c2_i32 : i32 to index
    %c0_18 = arith.constant 0 : index
    %c0_19 = arith.constant 0 : index
    %72 = vector.load %arg2[%71, %c0_18, %c0_19] : memref<8x2x32xf32, #tpu.memory_space<vmem>>, vector<1x2x32xf32>
    %73 = vector.shape_cast %72 : vector<1x2x32xf32> to vector<2x32xf32>
    %74 = vector.shape_cast %70 : vector<2x32xf32> to vector<1x2x32xf32>
    tpu.vector_store %arg2[%71, %c0_18, %c0_19], %74 {strides = array<i32>} : memref<8x2x32xf32, #tpu.memory_space<vmem>>, vector<1x2x32xf32>,
    %c3_i32 = arith.constant 3 : i32
    %75 = arith.index_cast %c3_i32 : i32 to index
    %c0_20 = arith.constant 0 : index
    %c0_21 = arith.constant 0 : index
    %76 = vector.load %arg0[%75, %c0_20, %c0_21] : memref<8x2x128xf32, #tpu.memory_space<vmem>>, vector<1x2x128xf32>
    %77 = vector.shape_cast %76 : vector<1x2x128xf32> to vector<2x128xf32>
    %cst_22 = arith.constant dense<0.000000e+00> : vector<2x128xf32>
    %78 = tpu.matmul %70, %0, %cst_22 {dimension_numbers = #tpu.dot_dimension_numbers<[1], [0], [0], [1], [0, 0, 1, 1], [], []>} : vector<2x32xf32>, vector<32x128xf32>, vector<2x128xf32> -> vector<2x128xf32>
    %79 = arith.addf %77, %78 : vector<2x128xf32>
    %80 = arith.negf %79 : vector<2x128xf32>
    %81 = math.exp %80 : vector<2x128xf32>
    %cst_23 = arith.constant 1.000000e+00 : f32
    %82 = vector.broadcast %cst_23 : f32 to vector<2x128xf32>
    %83 = arith.addf %82, %81 : vector<2x128xf32>
    %84 = arith.divf %82, %83 : vector<2x128xf32>
    %85 = math.tanh %79 : vector<2x128xf32>
    %86 = vector.extract_strided_slice %84 {offsets = [0, 0], sizes = [2, 32], strides = [1, 1]} : vector<2x128xf32> to vector<2x32xf32>
    %87 = vector.extract_strided_slice %84 {offsets = [0, 32], sizes = [2, 32], strides = [1, 1]} : vector<2x128xf32> to vector<2x32xf32>
    %88 = vector.extract_strided_slice %85 {offsets = [0, 64], sizes = [2, 32], strides = [1, 1]} : vector<2x128xf32> to vector<2x32xf32>
    %89 = vector.extract_strided_slice %84 {offsets = [0, 96], sizes = [2, 32], strides = [1, 1]} : vector<2x128xf32> to vector<2x32xf32>
    %90 = arith.mulf %87, %68 : vector<2x32xf32>
    %91 = arith.mulf %86, %88 : vector<2x32xf32>
    %92 = arith.addf %90, %91 : vector<2x32xf32>
    %93 = math.tanh %92 : vector<2x32xf32>
    %94 = arith.mulf %89, %93 : vector<2x32xf32>
    %95 = arith.index_cast %c3_i32 : i32 to index
    %c0_24 = arith.constant 0 : index
    %c0_25 = arith.constant 0 : index
    %96 = vector.load %arg2[%95, %c0_24, %c0_25] : memref<8x2x32xf32, #tpu.memory_space<vmem>>, vector<1x2x32xf32>
    %97 = vector.shape_cast %96 : vector<1x2x32xf32> to vector<2x32xf32>
    %98 = vector.shape_cast %94 : vector<2x32xf32> to vector<1x2x32xf32>
    tpu.vector_store %arg2[%95, %c0_24, %c0_25], %98 {strides = array<i32>} : memref<8x2x32xf32, #tpu.memory_space<vmem>>, vector<1x2x32xf32>,
    %c4_i32 = arith.constant 4 : i32
    %99 = arith.index_cast %c4_i32 : i32 to index
    %c0_26 = arith.constant 0 : index
    %c0_27 = arith.constant 0 : index
    %100 = vector.load %arg0[%99, %c0_26, %c0_27] : memref<8x2x128xf32, #tpu.memory_space<vmem>>, vector<1x2x128xf32>
    %101 = vector.shape_cast %100 : vector<1x2x128xf32> to vector<2x128xf32>
    %cst_28 = arith.constant dense<0.000000e+00> : vector<2x128xf32>
    %102 = tpu.matmul %94, %0, %cst_28 {dimension_numbers = #tpu.dot_dimension_numbers<[1], [0], [0], [1], [0, 0, 1, 1], [], []>} : vector<2x32xf32>, vector<32x128xf32>, vector<2x128xf32> -> vector<2x128xf32>
    %103 = arith.addf %101, %102 : vector<2x128xf32>
    %104 = arith.negf %103 : vector<2x128xf32>
    %105 = math.exp %104 : vector<2x128xf32>
    %cst_29 = arith.constant 1.000000e+00 : f32
    %106 = vector.broadcast %cst_29 : f32 to vector<2x128xf32>
    %107 = arith.addf %106, %105 : vector<2x128xf32>
    %108 = arith.divf %106, %107 : vector<2x128xf32>
    %109 = math.tanh %103 : vector<2x128xf32>
    %110 = vector.extract_strided_slice %108 {offsets = [0, 0], sizes = [2, 32], strides = [1, 1]} : vector<2x128xf32> to vector<2x32xf32>
    %111 = vector.extract_strided_slice %108 {offsets = [0, 32], sizes = [2, 32], strides = [1, 1]} : vector<2x128xf32> to vector<2x32xf32>
    %112 = vector.extract_strided_slice %109 {offsets = [0, 64], sizes = [2, 32], strides = [1, 1]} : vector<2x128xf32> to vector<2x32xf32>
    %113 = vector.extract_strided_slice %108 {offsets = [0, 96], sizes = [2, 32], strides = [1, 1]} : vector<2x128xf32> to vector<2x32xf32>
    %114 = arith.mulf %111, %92 : vector<2x32xf32>
    %115 = arith.mulf %110, %112 : vector<2x32xf32>
    %116 = arith.addf %114, %115 : vector<2x32xf32>
    %117 = math.tanh %116 : vector<2x32xf32>
    %118 = arith.mulf %113, %117 : vector<2x32xf32>
    %119 = arith.index_cast %c4_i32 : i32 to index
    %c0_30 = arith.constant 0 : index
    %c0_31 = arith.constant 0 : index
    %120 = vector.load %arg2[%119, %c0_30, %c0_31] : memref<8x2x32xf32, #tpu.memory_space<vmem>>, vector<1x2x32xf32>
    %121 = vector.shape_cast %120 : vector<1x2x32xf32> to vector<2x32xf32>
    %122 = vector.shape_cast %118 : vector<2x32xf32> to vector<1x2x32xf32>
    tpu.vector_store %arg2[%119, %c0_30, %c0_31], %122 {strides = array<i32>} : memref<8x2x32xf32, #tpu.memory_space<vmem>>, vector<1x2x32xf32>,
    %c5_i32 = arith.constant 5 : i32
    %123 = arith.index_cast %c5_i32 : i32 to index
    %c0_32 = arith.constant 0 : index
    %c0_33 = arith.constant 0 : index
    %124 = vector.load %arg0[%123, %c0_32, %c0_33] : memref<8x2x128xf32, #tpu.memory_space<vmem>>, vector<1x2x128xf32>
    %125 = vector.shape_cast %124 : vector<1x2x128xf32> to vector<2x128xf32>
    %cst_34 = arith.constant dense<0.000000e+00> : vector<2x128xf32>
    %126 = tpu.matmul %118, %0, %cst_34 {dimension_numbers = #tpu.dot_dimension_numbers<[1], [0], [0], [1], [0, 0, 1, 1], [], []>} : vector<2x32xf32>, vector<32x128xf32>, vector<2x128xf32> -> vector<2x128xf32>
    %127 = arith.addf %125, %126 : vector<2x128xf32>
    %128 = arith.negf %127 : vector<2x128xf32>
    %129 = math.exp %128 : vector<2x128xf32>
    %cst_35 = arith.constant 1.000000e+00 : f32
    %130 = vector.broadcast %cst_35 : f32 to vector<2x128xf32>
    %131 = arith.addf %130, %129 : vector<2x128xf32>
    %132 = arith.divf %130, %131 : vector<2x128xf32>
    %133 = math.tanh %127 : vector<2x128xf32>
    %134 = vector.extract_strided_slice %132 {offsets = [0, 0], sizes = [2, 32], strides = [1, 1]} : vector<2x128xf32> to vector<2x32xf32>
    %135 = vector.extract_strided_slice %132 {offsets = [0, 32], sizes = [2, 32], strides = [1, 1]} : vector<2x128xf32> to vector<2x32xf32>
    %136 = vector.extract_strided_slice %133 {offsets = [0, 64], sizes = [2, 32], strides = [1, 1]} : vector<2x128xf32> to vector<2x32xf32>
    %137 = vector.extract_strided_slice %132 {offsets = [0, 96], sizes = [2, 32], strides = [1, 1]} : vector<2x128xf32> to vector<2x32xf32>
    %138 = arith.mulf %135, %116 : vector<2x32xf32>
    %139 = arith.mulf %134, %136 : vector<2x32xf32>
    %140 = arith.addf %138, %139 : vector<2x32xf32>
    %141 = math.tanh %140 : vector<2x32xf32>
    %142 = arith.mulf %137, %141 : vector<2x32xf32>
    %143 = arith.index_cast %c5_i32 : i32 to index
    %c0_36 = arith.constant 0 : index
    %c0_37 = arith.constant 0 : index
    %144 = vector.load %arg2[%143, %c0_36, %c0_37] : memref<8x2x32xf32, #tpu.memory_space<vmem>>, vector<1x2x32xf32>
    %145 = vector.shape_cast %144 : vector<1x2x32xf32> to vector<2x32xf32>
    %146 = vector.shape_cast %142 : vector<2x32xf32> to vector<1x2x32xf32>
    tpu.vector_store %arg2[%143, %c0_36, %c0_37], %146 {strides = array<i32>} : memref<8x2x32xf32, #tpu.memory_space<vmem>>, vector<1x2x32xf32>,
    %c6_i32 = arith.constant 6 : i32
    %147 = arith.index_cast %c6_i32 : i32 to index
    %c0_38 = arith.constant 0 : index
    %c0_39 = arith.constant 0 : index
    %148 = vector.load %arg0[%147, %c0_38, %c0_39] : memref<8x2x128xf32, #tpu.memory_space<vmem>>, vector<1x2x128xf32>
    %149 = vector.shape_cast %148 : vector<1x2x128xf32> to vector<2x128xf32>
    %cst_40 = arith.constant dense<0.000000e+00> : vector<2x128xf32>
    %150 = tpu.matmul %142, %0, %cst_40 {dimension_numbers = #tpu.dot_dimension_numbers<[1], [0], [0], [1], [0, 0, 1, 1], [], []>} : vector<2x32xf32>, vector<32x128xf32>, vector<2x128xf32> -> vector<2x128xf32>
    %151 = arith.addf %149, %150 : vector<2x128xf32>
    %152 = arith.negf %151 : vector<2x128xf32>
    %153 = math.exp %152 : vector<2x128xf32>
    %cst_41 = arith.constant 1.000000e+00 : f32
    %154 = vector.broadcast %cst_41 : f32 to vector<2x128xf32>
    %155 = arith.addf %154, %153 : vector<2x128xf32>
    %156 = arith.divf %154, %155 : vector<2x128xf32>
    %157 = math.tanh %151 : vector<2x128xf32>
    %158 = vector.extract_strided_slice %156 {offsets = [0, 0], sizes = [2, 32], strides = [1, 1]} : vector<2x128xf32> to vector<2x32xf32>
    %159 = vector.extract_strided_slice %156 {offsets = [0, 32], sizes = [2, 32], strides = [1, 1]} : vector<2x128xf32> to vector<2x32xf32>
    %160 = vector.extract_strided_slice %157 {offsets = [0, 64], sizes = [2, 32], strides = [1, 1]} : vector<2x128xf32> to vector<2x32xf32>
    %161 = vector.extract_strided_slice %156 {offsets = [0, 96], sizes = [2, 32], strides = [1, 1]} : vector<2x128xf32> to vector<2x32xf32>
    %162 = arith.mulf %159, %140 : vector<2x32xf32>
    %163 = arith.mulf %158, %160 : vector<2x32xf32>
    %164 = arith.addf %162, %163 : vector<2x32xf32>
    %165 = math.tanh %164 : vector<2x32xf32>
    %166 = arith.mulf %161, %165 : vector<2x32xf32>
    %167 = arith.index_cast %c6_i32 : i32 to index
    %c0_42 = arith.constant 0 : index
    %c0_43 = arith.constant 0 : index
    %168 = vector.load %arg2[%167, %c0_42, %c0_43] : memref<8x2x32xf32, #tpu.memory_space<vmem>>, vector<1x2x32xf32>
    %169 = vector.shape_cast %168 : vector<1x2x32xf32> to vector<2x32xf32>
    %170 = vector.shape_cast %166 : vector<2x32xf32> to vector<1x2x32xf32>
    tpu.vector_store %arg2[%167, %c0_42, %c0_43], %170 {strides = array<i32>} : memref<8x2x32xf32, #tpu.memory_space<vmem>>, vector<1x2x32xf32>,
    %c7_i32 = arith.constant 7 : i32
    %171 = arith.index_cast %c7_i32 : i32 to index
    %c0_44 = arith.constant 0 : index
    %c0_45 = arith.constant 0 : index
    %172 = vector.load %arg0[%171, %c0_44, %c0_45] : memref<8x2x128xf32, #tpu.memory_space<vmem>>, vector<1x2x128xf32>
    %173 = vector.shape_cast %172 : vector<1x2x128xf32> to vector<2x128xf32>
    %cst_46 = arith.constant dense<0.000000e+00> : vector<2x128xf32>
    %174 = tpu.matmul %166, %0, %cst_46 {dimension_numbers = #tpu.dot_dimension_numbers<[1], [0], [0], [1], [0, 0, 1, 1], [], []>} : vector<2x32xf32>, vector<32x128xf32>, vector<2x128xf32> -> vector<2x128xf32>
    %175 = arith.addf %173, %174 : vector<2x128xf32>
    %176 = arith.negf %175 : vector<2x128xf32>
    %177 = math.exp %176 : vector<2x128xf32>
    %cst_47 = arith.constant 1.000000e+00 : f32
    %178 = vector.broadcast %cst_47 : f32 to vector<2x128xf32>
    %179 = arith.addf %178, %177 : vector<2x128xf32>
    %180 = arith.divf %178, %179 : vector<2x128xf32>
    %181 = math.tanh %175 : vector<2x128xf32>
    %182 = vector.extract_strided_slice %180 {offsets = [0, 0], sizes = [2, 32], strides = [1, 1]} : vector<2x128xf32> to vector<2x32xf32>
    %183 = vector.extract_strided_slice %180 {offsets = [0, 32], sizes = [2, 32], strides = [1, 1]} : vector<2x128xf32> to vector<2x32xf32>
    %184 = vector.extract_strided_slice %181 {offsets = [0, 64], sizes = [2, 32], strides = [1, 1]} : vector<2x128xf32> to vector<2x32xf32>
    %185 = vector.extract_strided_slice %180 {offsets = [0, 96], sizes = [2, 32], strides = [1, 1]} : vector<2x128xf32> to vector<2x32xf32>
    %186 = arith.mulf %183, %164 : vector<2x32xf32>
    %187 = arith.mulf %182, %184 : vector<2x32xf32>
    %188 = arith.addf %186, %187 : vector<2x32xf32>
    %189 = math.tanh %188 : vector<2x32xf32>
    %190 = arith.mulf %185, %189 : vector<2x32xf32>
    %191 = arith.index_cast %c7_i32 : i32 to index
    %c0_48 = arith.constant 0 : index
    %c0_49 = arith.constant 0 : index
    %192 = vector.load %arg2[%191, %c0_48, %c0_49] : memref<8x2x32xf32, #tpu.memory_space<vmem>>, vector<1x2x32xf32>
    %193 = vector.shape_cast %192 : vector<1x2x32xf32> to vector<2x32xf32>
    %194 = vector.shape_cast %190 : vector<2x32xf32> to vector<1x2x32xf32>
    tpu.vector_store %arg2[%191, %c0_48, %c0_49], %194 {strides = array<i32>} : memref<8x2x32xf32, #tpu.memory_space<vmem>>, vector<1x2x32xf32>,
    %c8_i32 = arith.constant 8 : i32
    %c0_50 = arith.constant 0 : index
    %c0_51 = arith.constant 0 : index
    %195 = vector.load %arg3[%c0_50, %c0_51] : memref<2x32xf32, #tpu.memory_space<vmem>>, vector<2x32xf32>
    tpu.vector_store %arg3[%c0_50, %c0_51], %190 {strides = array<i32>} : memref<2x32xf32, #tpu.memory_space<vmem>>, vector<2x32xf32>,
    %c0_52 = arith.constant 0 : index
    %c0_53 = arith.constant 0 : index
    %196 = vector.load %arg4[%c0_52, %c0_53] : memref<2x32xf32, #tpu.memory_space<vmem>>, vector<2x32xf32>
    tpu.vector_store %arg4[%c0_52, %c0_53], %188 {strides = array<i32>} : memref<2x32xf32, #tpu.memory_space<vmem>>, vector<2x32xf32>,
    return
  }
}

</mosaic_0001>

<bundles_post_ra>
// kernel: lstm_reg_forward.1
= control target key start
LH: loop header
LB: loop body
LE: loop exit
PB: predicated region body
PF: predicated region fallthrough
CT: control target
= control target key end

     0   :  { %10 = vsyncpa [#allocation3], 0  ;;  %v1224_v3 = vmov 0.0|0.0   ;;  %vm1225_vm0 = vmmov 0   ;;  %v1226_v6 = vmov 0.0   ;;  %s1443_s0 = inlined_call_operand.vmem [shape: f32[8,2,128], index: 0, kind: input, shape index: {}]   ;;  %s1444_s1 = inlined_call_operand.vmem [shape: f32[32,128], index: 1, kind: input, shape index: {}]   ;;  %s1445_s2 = inlined_call_operand.vmem [shape: f32[8,2,32], index: 2, kind: output, shape index: {0}]   ;;  %s1446_s3 = inlined_call_operand.hbm [shape: f32[2,32], index: 3, kind: output, shape index: {1}]   ;;  %s1447_s4 = inlined_call_operand.hbm [shape: f32[2,32], index: 4, kind: output, shape index: {2}]  }
   0x1   :  { %v16_v0 = vld [vmem:[%s1444_s1] sm:$0xff]  ;;  %v17_v1 = vld [vmem:[%s1444_s1 + $0x8] sm:$0xff]  ;;  %v18_v2 = vld [vmem:[%s1444_s1 + $0x10] sm:$0xff]  ;;  %1056 = vmatprep.subr.bf16.mxu0 %v1224_v3  ;;  %976 = vmatprep.mubr.msk.f32.mxu0 %vm1225_vm0, %v1226_v6 }
   0x2   :  { %v1267_v4 = vpack.c.bf16 %v17_v1, %v16_v0  ;;  %v19_v5 = vld [vmem:[%s1444_s1 + $0x18] sm:$0xff] }
   0x3   :  { %11 = vsyncpa [#allocation5], 0  ;;  %1062 = vmatprep.subr.bf16.mxu1 %v1224_v3  ;;  %987 = vmatprep.mubr.msk.f32.mxu1 %vm1225_vm0, %v1226_v6  ;;  %v1278_v7 = vpack.c.bf16 %v19_v5, %v18_v2  ;;  %v20_v8 = vld [vmem:[%s1443_s0] sm:$0x3]  ;;  %s1227_s24 = smov 64   ;;  %s1228_s25 = smov 32  }
   0x4   :  { %1058 = vmatpush3.bf16.msra.mxu0 %v1267_v4  ;;  %1064 = vmatpush3.bf16.msra.mxu1 %v1267_v4  ;;  %vm124_vm1 = vcmask 254976   ;;  %vm21_vm2 = vcmask 261120   ;;  %v900_v26 = vld [vmem:[%s1443_s0 + $0x2] sm:$0x3]  ;;  %v904_v44 = vld [vmem:[%s1443_s0 + $0x4] sm:$0x3] }
   0x5   :  { %1059 = vmatprep.subr.bf16.mxu0 %v1224_v3  ;;  %1065 = vmatprep.subr.bf16.mxu1 %v1224_v3  ;;  %v908_v62 = vld [vmem:[%s1443_s0 + $0x6] sm:$0x3]  ;;  %s1230_s29 = smov [#allocation4]  }
   0x6   :  { %s885_s30 = sshll.u32 %s1230_s29, 4  ;;  %s886_s30 = int_to_ptr.vmem [resolvable:$true] %s885_s30 }
   0x7   :  { %s1176_s5 = scalar_lea.vmem %s886_s30, 32  ;;  %p1181_p1 = scmp.lt.s32.totalorder %s886_s30, %s886_s30 }
   0x8   :  { %1061 = vmatpush3.bf16.msra.mxu0 %v1278_v7  ;;  %1067 = vmatpush3.bf16.msra.mxu1 %v1278_v7  ;;  %p1177_p0 = scmp.ne.s32.totalorder %s886_s30, %s1176_s5  ;;  %p1182_p2 = scmp.lt.s32.totalorder %s1176_s5, %s1176_s5 }
   0x9   :  { %1068 = vmatprep.subr.bf16.mxu0 %v1224_v3  ;;  %1074 = vmatprep.subr.bf16.mxu1 %v1224_v3 }
   0xa   :  { %p1183_p3 = por %p1182_p2, %p1181_p1 }
   0xb   :  { %977 = vmatmul.mubr.f32.vlgmr.msra.gmra.mrb[0].mxu0 %v1226_v6 }
   0xc   :  { %1070 = vmatpush3.bf16.msra.mxu0 %v1267_v4  ;;  %998 = vmatprep.mubr.msk.f32.mxu0 %vm1225_vm0, %v1226_v6  ;;  %p1184_p4 = pnand %p1183_p3, %p1177_p0 }
   0xd   :  { %1071 = vmatprep.subr.bf16.mxu0 %v1224_v3 }
  0x10   :  { %1073 = vmatpush3.bf16.msra.mxu0 %v1278_v7 }
  0x11   :  { %1080 = vmatprep.subr.bf16.mxu0 %v1224_v3 }
  0xde   :  { %v91_v9 = vpop.f32.mrb[0].mxu0 }
  0xdf   :  { %v95_v10 = vadd.f32 %v91_v9, %v20_v8  ;;  %v978_v11 = vpop.f32.mrb[1].mxu0 }
  0xe1   :  { %1112 = vtanh.f32 %v95_v10  ;;  %v899_v13 = vmul.f32 -1.442695, %v95_v10 }
  0xe3   :  { %1114 = vpow2.f32 %v899_v13 }
  0xeb   :  { %v1113_v12 = vpop.eup %1112 }
  0xec   :  { %105 = vrot.lane.b32.xlu0 %v1113_v12, %s1227_s24 }
  0xed   :  { %v1115_v14 = vpop.eup %1114 }
  0xee   :  { %v99_v15 = vadd.f32 1.0, %v1115_v14 }
  0xf0   :  { %1116 = vrcp.f32 %v99_v15 }
  0xfa   :  { %v1117_v16 = vpop.eup %1116 }
  0xfb   :  { %v103_v19 = vmul.f32 0.0, %v1117_v16 }
 0x15e   :  { %v106_v17 = vpop.permute.xlu0 %105 }
 0x15f   :  { %v108_v18 = vmul.f32 %v1117_v16, %v106_v17 }
 0x161   :  { %110 = vrot.lane.b32.xlu0 %v108_v18, %s1228_s25 }
 0x1d3   :  { %v111_v20 = vpop.permute.xlu0 %110 }
 0x1d4   :  { %v113_v21 = vadd.f32 %v111_v20, %v103_v19  ;;  %v912_v20 = vld [vmem:[%s1443_s0 + $0x8] sm:$0x3] }
 0x1d6   :  { %1118 = vtanh.f32 %v113_v21 }
 0x1e0   :  { %v1119_v22 = vpop.eup %1118 }
 0x1e1   :  { %116 = vrot.lane.b32.xlu1 %v1119_v22, %s1227_s24 }
 0x253   :  { %v117_v23 = vpop.permute.xlu1 %116 }
 0x254   :  { %v119_v24 = vmul.f32 %v1117_v16, %v117_v23 }
 0x256   :  { %121 = vrot.lane.b32.xlu1 %v119_v24, %s1228_s25 }
 0x2c8   :  { %v122_v25 = vpop.permute.xlu1 %121 }
 0x2c9   :  { %125 = vst.msk [vmem:[%s1445_s2] sm:$0x3] %vm124_vm1, %v122_v25  ;;  %988 = vmatmul.mubr.msk.f32.vlgmr.msra.gmra.mrb[0].mxu1 %vm21_vm2, %v122_v25 }
 0x2ca   :  { %1076 = vmatpush3.bf16.msra.mxu1 %v1267_v4  ;;  %1009 = vmatprep.mubr.msk.f32.mxu1 %vm1225_vm0, %v1226_v6 }
 0x2cb   :  { %1077 = vmatprep.subr.bf16.mxu1 %v1224_v3 }
 0x2ce   :  { %1079 = vmatpush3.bf16.msra.mxu1 %v1278_v7 }
 0x2cf   :  { %1086 = vmatprep.subr.bf16.mxu1 %v1224_v3 }
 0x39c   :  { %v196_v27 = vpop.f32.mrb[0].mxu1 }
 0x39d   :  { %v200_v28 = vadd.f32 %v900_v26, %v196_v27  ;;  %v989_v29 = vpop.f32.mrb[1].mxu1 }
 0x39f   :  { %1120 = vtanh.f32 %v200_v28  ;;  %v902_v31 = vmul.f32 -1.442695, %v200_v28 }
 0x3a1   :  { %1122 = vpow2.f32 %v902_v31 }
 0x3a9   :  { %v1121_v30 = vpop.eup %1120 }
 0x3aa   :  { %210 = vrot.lane.b32.xlu0 %v1121_v30, %s1227_s24 }
 0x3ab   :  { %v1123_v32 = vpop.eup %1122 }
 0x3ac   :  { %v204_v33 = vadd.f32 1.0, %v1123_v32 }
 0x3ae   :  { %1124 = vrcp.f32 %v204_v33 }
 0x3b8   :  { %v1125_v34 = vpop.eup %1124 }
 0x3b9   :  { %v208_v37 = vmul.f32 %v1125_v34, %v113_v21 }
 0x41c   :  { %v211_v35 = vpop.permute.xlu0 %210 }
 0x41d   :  { %v213_v36 = vmul.f32 %v1125_v34, %v211_v35 }
 0x41f   :  { %215 = vrot.lane.b32.xlu1 %v213_v36, %s1228_s25 }
 0x491   :  { %v216_v38 = vpop.permute.xlu1 %215 }
 0x492   :  { %v218_v39 = vadd.f32 %v216_v38, %v208_v37  ;;  %v916_v38 = vld [vmem:[%s1443_s0 + $0xa] sm:$0x3] }
 0x494   :  { %1126 = vtanh.f32 %v218_v39 }
 0x49e   :  { %v1127_v40 = vpop.eup %1126 }
 0x49f   :  { %221 = vrot.lane.b32.xlu0 %v1127_v40, %s1227_s24 }
 0x511   :  { %v222_v41 = vpop.permute.xlu0 %221 }
 0x512   :  { %v224_v42 = vmul.f32 %v1125_v34, %v222_v41 }
 0x514   :  { %226 = vrot.lane.b32.xlu1 %v224_v42, %s1228_s25 }
 0x586   :  { %v227_v43 = vpop.permute.xlu1 %226 }
 0x587   :  { %903 = vst.msk [vmem:[%s1445_s2 + $0x2] sm:$0x3] %vm124_vm1, %v227_v43  ;;  %999 = vmatmul.mubr.msk.f32.vlgmr.msra.gmra.mrb[2].mxu0 %vm21_vm2, %v227_v43 }
 0x588   :  { %1082 = vmatpush3.bf16.msra.mxu0 %v1267_v4  ;;  %1020 = vmatprep.mubr.msk.f32.mxu0 %vm1225_vm0, %v1226_v6 }
 0x589   :  { %1083 = vmatprep.subr.bf16.mxu0 %v1224_v3 }
 0x58c   :  { %1085 = vmatpush3.bf16.msra.mxu0 %v1278_v7 }
 0x58d   :  { %1092 = vmatprep.subr.bf16.mxu0 %v1224_v3 }
 0x65a   :  { %v301_v45 = vpop.f32.mrb[2].mxu0 }
 0x65b   :  { %v305_v46 = vadd.f32 %v904_v44, %v301_v45  ;;  %v1000_v47 = vpop.f32.mrb[3].mxu0 }
 0x65d   :  { %1128 = vtanh.f32 %v305_v46  ;;  %v906_v49 = vmul.f32 -1.442695, %v305_v46 }
 0x65f   :  { %1130 = vpow2.f32 %v906_v49 }
 0x667   :  { %v1129_v48 = vpop.eup %1128 }
 0x668   :  { %315 = vrot.lane.b32.xlu0 %v1129_v48, %s1227_s24 }
 0x669   :  { %v1131_v50 = vpop.eup %1130 }
 0x66a   :  { %v309_v51 = vadd.f32 1.0, %v1131_v50 }
 0x66c   :  { %1132 = vrcp.f32 %v309_v51 }
 0x676   :  { %v1133_v52 = vpop.eup %1132 }
 0x677   :  { %v313_v55 = vmul.f32 %v1133_v52, %v218_v39 }
 0x6da   :  { %v316_v53 = vpop.permute.xlu0 %315 }
 0x6db   :  { %v318_v54 = vmul.f32 %v1133_v52, %v316_v53 }
 0x6dd   :  { %320 = vrot.lane.b32.xlu1 %v318_v54, %s1228_s25 }
 0x74f   :  { %v321_v56 = vpop.permute.xlu1 %320 }
 0x750   :  { %v323_v57 = vadd.f32 %v321_v56, %v313_v55 }
 0x752   :  { %1134 = vtanh.f32 %v323_v57 }
 0x75c   :  { %v1135_v58 = vpop.eup %1134 }
 0x75d   :  { %326 = vrot.lane.b32.xlu0 %v1135_v58, %s1227_s24 }
 0x7cf   :  { %v327_v59 = vpop.permute.xlu0 %326 }
 0x7d0   :  { %v329_v60 = vmul.f32 %v1133_v52, %v327_v59  ;;  %v920_v52 = vld [vmem:[%s1443_s0 + $0xc] sm:$0x3] }
 0x7d2   :  { %331 = vrot.lane.b32.xlu1 %v329_v60, %s1228_s25 }
 0x844   :  { %v332_v61 = vpop.permute.xlu1 %331 }
 0x845   :  { %907 = vst.msk [vmem:[%s1445_s2 + $0x4] sm:$0x3] %vm124_vm1, %v332_v61  ;;  %1010 = vmatmul.mubr.msk.f32.vlgmr.msra.gmra.mrb[2].mxu1 %vm21_vm2, %v332_v61 }
 0x846   :  { %1088 = vmatpush3.bf16.msra.mxu1 %v1267_v4  ;;  %1031 = vmatprep.mubr.msk.f32.mxu1 %vm1225_vm0, %v1226_v6 }
 0x847   :  { %1089 = vmatprep.subr.bf16.mxu1 %v1224_v3 }
 0x84a   :  { %1091 = vmatpush3.bf16.msra.mxu1 %v1278_v7 }
 0x84b   :  { %1098 = vmatprep.subr.bf16.mxu1 %v1224_v3 }
 0x918   :  { %v406_v63 = vpop.f32.mrb[2].mxu1 }
 0x919   :  { %v410_v0 = vadd.f32 %v908_v62, %v406_v63  ;;  %v1011_v1 = vpop.f32.mrb[3].mxu1 }
 0x91b   :  { %1136 = vtanh.f32 %v410_v0  ;;  %v910_v5 = vmul.f32 -1.442695, %v410_v0 }
 0x91d   :  { %1138 = vpow2.f32 %v910_v5 }
 0x925   :  { %v1137_v2 = vpop.eup %1136 }
 0x926   :  { %420 = vrot.lane.b32.xlu0 %v1137_v2, %s1227_s24 }
 0x927   :  { %v1139_v8 = vpop.eup %1138 }
 0x928   :  { %v414_v9 = vadd.f32 1.0, %v1139_v8 }
 0x92a   :  { %1140 = vrcp.f32 %v414_v9 }
 0x934   :  { %v1141_v10 = vpop.eup %1140 }
 0x935   :  { %v418_v13 = vmul.f32 %v1141_v10, %v323_v57 }
 0x998   :  { %v421_v11 = vpop.permute.xlu0 %420 }
 0x999   :  { %v423_v12 = vmul.f32 %v1141_v10, %v421_v11 }
 0x99b   :  { %425 = vrot.lane.b32.xlu1 %v423_v12, %s1228_s25 }
 0xa0d   :  { %v426_v14 = vpop.permute.xlu1 %425 }
 0xa0e   :  { %v428_v15 = vadd.f32 %v426_v14, %v418_v13 }
 0xa10   :  { %1142 = vtanh.f32 %v428_v15 }
 0xa1a   :  { %v1143_v16 = vpop.eup %1142 }
 0xa1b   :  { %431 = vrot.lane.b32.xlu0 %v1143_v16, %s1227_s24 }
 0xa8d   :  { %v432_v17 = vpop.permute.xlu0 %431 }
 0xa8e   :  { %v434_v18 = vmul.f32 %v1141_v10, %v432_v17  ;;  %v924_v10 = vld [vmem:[%s1443_s0 + $0xe] sm:$0x3]  ;;  %s1229_s0 = smov 96  }
 0xa90   :  { %436 = vrot.lane.b32.xlu1 %v434_v18, %s1228_s25 }
 0xb02   :  { %v437_v19 = vpop.permute.xlu1 %436 }
 0xb03   :  { %911 = vst.msk [vmem:[%s1445_s2 + $0x6] sm:$0x3] %vm124_vm1, %v437_v19  ;;  %1021 = vmatmul.mubr.msk.f32.vlgmr.msra.gmra.mrb[4].mxu0 %vm21_vm2, %v437_v19 }
 0xb04   :  { %1094 = vmatpush3.bf16.msra.mxu0 %v1267_v4  ;;  %1042 = vmatprep.mubr.msk.f32.mxu0 %vm1225_vm0, %v1226_v6 }
 0xb05   :  { %1095 = vmatprep.subr.bf16.mxu0 %v1224_v3 }
 0xb08   :  { %1097 = vmatpush3.bf16.msra.mxu0 %v1278_v7 }
 0xbd6   :  { %v511_v21 = vpop.f32.mrb[4].mxu0 }
 0xbd7   :  { %v515_v22 = vadd.f32 %v912_v20, %v511_v21  ;;  %v1022_v23 = vpop.f32.mrb[5].mxu0 }
 0xbd9   :  { %1144 = vtanh.f32 %v515_v22  ;;  %v914_v25 = vmul.f32 -1.442695, %v515_v22 }
 0xbdb   :  { %1146 = vpow2.f32 %v914_v25 }
 0xbe3   :  { %v1145_v24 = vpop.eup %1144 }
 0xbe4   :  { %525 = vrot.lane.b32.xlu0 %v1145_v24, %s1227_s24 }
 0xbe5   :  { %v1147_v26 = vpop.eup %1146 }
 0xbe6   :  { %v519_v27 = vadd.f32 1.0, %v1147_v26 }
 0xbe8   :  { %1148 = vrcp.f32 %v519_v27 }
 0xbf2   :  { %v1149_v28 = vpop.eup %1148 }
 0xbf3   :  { %v523_v31 = vmul.f32 %v1149_v28, %v428_v15 }
 0xc56   :  { %v526_v29 = vpop.permute.xlu0 %525 }
 0xc57   :  { %v528_v30 = vmul.f32 %v1149_v28, %v526_v29 }
 0xc59   :  { %530 = vrot.lane.b32.xlu1 %v528_v30, %s1228_s25 }
 0xccb   :  { %v531_v32 = vpop.permute.xlu1 %530 }
 0xccc   :  { %v533_v33 = vadd.f32 %v531_v32, %v523_v31 }
 0xcce   :  { %1150 = vtanh.f32 %v533_v33 }
 0xcd8   :  { %v1151_v34 = vpop.eup %1150 }
 0xcd9   :  { %536 = vrot.lane.b32.xlu0 %v1151_v34, %s1227_s24 }
 0xd4b   :  { %v537_v35 = vpop.permute.xlu0 %536 }
 0xd4c   :  { %v539_v36 = vmul.f32 %v1149_v28, %v537_v35 }
 0xd4e   :  { %541 = vrot.lane.b32.xlu1 %v539_v36, %s1228_s25 }
 0xdc0   :  { %v542_v37 = vpop.permute.xlu1 %541 }
 0xdc1   :  { %915 = vst.msk [vmem:[%s1445_s2 + $0x8] sm:$0x3] %vm124_vm1, %v542_v37  ;;  %1032 = vmatmul.mubr.msk.f32.vlgmr.msra.gmra.mrb[4].mxu1 %vm21_vm2, %v542_v37 }
 0xdc2   :  { %1100 = vmatpush3.bf16.msra.mxu1 %v1267_v4  ;;  %1053 = vmatprep.mubr.msk.f32.mxu1 %vm1225_vm0, %v1226_v6 }
 0xdc3   :  { %1101 = vmatprep.subr.bf16.mxu1 %v1224_v3 }
 0xdc6   :  { %1103 = vmatpush3.bf16.msra.mxu1 %v1278_v7 }
 0xe94   :  { %v616_v39 = vpop.f32.mrb[4].mxu1 }
 0xe95   :  { %v620_v40 = vadd.f32 %v916_v38, %v616_v39  ;;  %v1033_v41 = vpop.f32.mrb[5].mxu1 }
 0xe97   :  { %1152 = vtanh.f32 %v620_v40  ;;  %v918_v43 = vmul.f32 -1.442695, %v620_v40 }
 0xe99   :  { %1154 = vpow2.f32 %v918_v43 }
 0xea1   :  { %v1153_v42 = vpop.eup %1152 }
 0xea2   :  { %630 = vrot.lane.b32.xlu0 %v1153_v42, %s1227_s24 }
 0xea3   :  { %v1155_v4 = vpop.eup %1154 }
 0xea4   :  { %v624_v44 = vadd.f32 1.0, %v1155_v4 }
 0xea6   :  { %1156 = vrcp.f32 %v624_v44 }
 0xeb0   :  { %v1157_v6 = vpop.eup %1156 }
 0xeb1   :  { %v628_v7 = vmul.f32 %v1157_v6, %v533_v33 }
 0xf14   :  { %v631_v3 = vpop.permute.xlu0 %630 }
 0xf15   :  { %v633_v45 = vmul.f32 %v1157_v6, %v631_v3 }
 0xf17   :  { %635 = vrot.lane.b32.xlu1 %v633_v45, %s1228_s25 }
 0xf89   :  { %v636_v46 = vpop.permute.xlu1 %635 }
 0xf8a   :  { %v638_v47 = vadd.f32 %v636_v46, %v628_v7 }
 0xf8c   :  { %1158 = vtanh.f32 %v638_v47 }
 0xf96   :  { %v1159_v48 = vpop.eup %1158 }
 0xf97   :  { %641 = vrot.lane.b32.xlu0 %v1159_v48, %s1227_s24 }
0x1009   :  { %v642_v49 = vpop.permute.xlu0 %641 }
0x100a   :  { %v644_v50 = vmul.f32 %v1157_v6, %v642_v49 }
0x100c   :  { %646 = vrot.lane.b32.xlu1 %v644_v50, %s1228_s25 }
0x107e   :  { %v647_v51 = vpop.permute.xlu1 %646 }
0x107f   :  { %919 = vst.msk [vmem:[%s1445_s2 + $0xa] sm:$0x3] %vm124_vm1, %v647_v51  ;;  %1043 = vmatmul.mubr.msk.f32.vlgmr.msra.gmra.mrb[6].mxu0 %vm21_vm2, %v647_v51 }
0x1152   :  { %v721_v53 = vpop.f32.mrb[6].mxu0 }
0x1153   :  { %v725_v54 = vadd.f32 %v920_v52, %v721_v53  ;;  %v1044_v55 = vpop.f32.mrb[7].mxu0 }
0x1155   :  { %1160 = vtanh.f32 %v725_v54  ;;  %v922_v57 = vmul.f32 -1.442695, %v725_v54 }
0x1157   :  { %1162 = vpow2.f32 %v922_v57 }
0x115f   :  { %v1161_v56 = vpop.eup %1160 }
0x1160   :  { %735 = vrot.lane.b32.xlu0 %v1161_v56, %s1227_s24 }
0x1161   :  { %v1163_v58 = vpop.eup %1162 }
0x1162   :  { %v729_v59 = vadd.f32 1.0, %v1163_v58 }
0x1164   :  { %1164 = vrcp.f32 %v729_v59 }
0x116e   :  { %v1165_v60 = vpop.eup %1164 }
0x116f   :  { %v733_v63 = vmul.f32 %v1165_v60, %v638_v47 }
0x11d2   :  { %v736_v61 = vpop.permute.xlu0 %735 }
0x11d3   :  { %v738_v62 = vmul.f32 %v1165_v60, %v736_v61 }
0x11d5   :  { %740 = vrot.lane.b32.xlu1 %v738_v62, %s1228_s25 }
0x1247   :  { %v741_v0 = vpop.permute.xlu1 %740 }
0x1248   :  { %v743_v1 = vadd.f32 %v741_v0, %v733_v63 }
0x124a   :  { %1166 = vtanh.f32 %v743_v1 }
0x1254   :  { %v1167_v2 = vpop.eup %1166 }
0x1255   :  { %746 = vrot.lane.b32.xlu0 %v1167_v2, %s1227_s24 }
0x12c7   :  { %v747_v5 = vpop.permute.xlu0 %746 }
0x12c8   :  { %v749_v8 = vmul.f32 %v1165_v60, %v747_v5 }
0x12ca   :  { %751 = vrot.lane.b32.xlu1 %v749_v8, %s1228_s25 }
0x133c   :  { %v752_v9 = vpop.permute.xlu1 %751 }
0x133d   :  { %923 = vst.msk [vmem:[%s1445_s2 + $0xc] sm:$0x3] %vm124_vm1, %v752_v9  ;;  %1054 = vmatmul.mubr.msk.f32.vlgmr.msra.gmra.mrb[6].mxu1 %vm21_vm2, %v752_v9 }
0x1410   :  { %v826_v11 = vpop.f32.mrb[6].mxu1 }
0x1411   :  { %v830_v12 = vadd.f32 %v924_v10, %v826_v11  ;;  %v1055_v13 = vpop.f32.mrb[7].mxu1 }
0x1413   :  { %1168 = vtanh.f32 %v830_v12  ;;  %v926_v15 = vmul.f32 -1.442695, %v830_v12 }
0x1415   :  { %1170 = vpow2.f32 %v926_v15 }
0x141d   :  { %v1169_v14 = vpop.eup %1168 }
0x141e   :  { %840 = vrot.lane.b32.xlu0 %v1169_v14, %s1227_s24 }
0x141f   :  { %v1171_v16 = vpop.eup %1170 }
0x1420   :  { %v834_v17 = vadd.f32 1.0, %v1171_v16 }
0x1422   :  { %1172 = vrcp.f32 %v834_v17 }
0x142c   :  { %v1173_v18 = vpop.eup %1172 }
0x142d   :  { %v838_v21 = vmul.f32 %v1173_v18, %v743_v1 }
0x1490   :  { %v841_v19 = vpop.permute.xlu0 %840 }
0x1491   :  { %v843_v20 = vmul.f32 %v1173_v18, %v841_v19 }
0x1493   :  { %845 = vrot.lane.b32.xlu1 %v843_v20, %s1228_s25 }
0x1505   :  { %v846_v22 = vpop.permute.xlu1 %845 }
0x1506   :  { %v848_v23 = vadd.f32 %v846_v22, %v838_v21 }
0x1508   :  { %1174 = vtanh.f32 %v848_v23 }
0x1512   :  { %v1175_v24 = vpop.eup %1174 }
0x1513   :  { %851 = vrot.lane.b32.xlu0 %v1175_v24, %s1227_s24 }
0x1517   :  { %863 = vrot.lane.b32.xlu0 %v848_v23, %s1229_s0 }
0x1585   :  { %v852_v25 = vpop.permute.xlu0 %851 }
0x1586   :  { %v854_v26 = vmul.f32 %v1173_v18, %v852_v25 }
0x1588   :  { %856 = vrot.lane.b32.xlu1 %v854_v26, %s1228_s25 }
0x1589   :  { %v864_v27 = vpop.permute.xlu0 %863 }
0x158a   :  { %866 = vst.msk [vmem:[#allocation4] sm:$0x3] %vm124_vm1, %v864_v27 }
0x158b   :  { %1187 = shalt.err (!%p1184_p4)
}
0x158c   :  { %s1188_s7 = scalar_lea.hbm %s1447_s4, 32 }
0x158d   :  { %p1189_p5 = scmp.ne.s32.totalorder %s1447_s4, %s1188_s7  ;;  %p1192_p6 = scmp.lt.u32.totalorder %s1188_s7, %s1447_s4 }
0x158f   :  { %p1194_p7 = pnand %p1192_p6, %p1189_p5 }
0x1591   :  { %1197 = shalt.err (!%p1194_p7)
}
0x1592   :  { %888 = dma.vmem_to_hbm [thread:$0]  %s886_s30, 32, %s1447_s4, [#allocation5]  }
0x1593   :  { %s1231_s13 = smov [#allocation2]  }
0x1594   :  { %s875_s14 = sshll.u32 %s1231_s13, 4  ;;  %s876_s14 = int_to_ptr.vmem [resolvable:$true] %s875_s14 }
0x1595   :  { %s1198_s17 = scalar_lea.vmem %s876_s14, 32  ;;  %p1203_p9 = scmp.lt.s32.totalorder %s876_s14, %s876_s14 }
0x1596   :  { %p1199_p8 = scmp.ne.s32.totalorder %s876_s14, %s1198_s17  ;;  %p1204_p10 = scmp.lt.s32.totalorder %s1198_s17, %s1198_s17 }
0x1598   :  { %p1205_p11 = por %p1204_p10, %p1203_p9 }
0x159a   :  { %p1206_p12 = pnand %p1205_p11, %p1199_p8 }
0x15fa   :  { %v857_v28 = vpop.permute.xlu1 %856 }
0x15fb   :  { %927 = vst.msk [vmem:[%s1445_s2 + $0xe] sm:$0x3] %vm124_vm1, %v857_v28  ;;  %861 = vst.msk [vmem:[#allocation2] sm:$0x3] %vm124_vm1, %v857_v28 }
0x15fc   :  { %1209 = shalt.err (!%p1206_p12)
}
0x15fd   :  { %s1210_s19 = scalar_lea.hbm %s1446_s3, 32 }
0x15fe   :  { %p1211_p13 = scmp.ne.s32.totalorder %s1446_s3, %s1210_s19  ;;  %p1214_p0 = scmp.lt.u32.totalorder %s1210_s19, %s1446_s3 }
0x1600   :  { %p1216_p1 = pnand %p1214_p0, %p1211_p13 }
0x1602   :  { %1219 = shalt.err (!%p1216_p1)
}
0x1603   :  { %878 = dma.vmem_to_hbm [thread:$0]  %s876_s14, 32, %s1446_s3, [#allocation3]  }
0x1604   :  { %1220 = dma.done.wait [#allocation3], 32  }
0x1605   :  { %1221 = vsyncadd [#allocation3], 4294967264 }
0x1606   :  { %1222 = dma.done.wait [#allocation5], 32  }
0x1607   :  { %1223 = vsyncadd [#allocation5], 4294967264 }
0x1608   :  { %897 = vsyncpa [#allocation3], 1 }
0x1609   :  { %898 = vsyncpa [#allocation5], 1 }

</bundles_post_ra>
